<compile_context>
chip_gen: v6e
topology: v6e:2x2x1
jax: 0.10.0
libtpu: 0.0.40
codegen_flags: <defaults>
</compile_context>

<pallas_src>
import functools
import jax
import jax.numpy as jnp
from jax import lax
from jax.experimental import pallas as pl
from jax.experimental.pallas import tpu as pltpu

_SUB = 8                             # sublane granularity
_LANE = 128                          # lane granularity
_VMEM_BUDGET = 36 * 1024 * 1024      # keep live buffers well under v7x's 64 MiB


def _round_up(v, m):
    return ((v + m - 1) // m) * m


def _graphconv_kernel(*refs, add_self, normalize, use_bias):
    if use_bias:
        adj_ref, x_ref, w_ref, b_ref, out_ref = refs
    else:
        adj_ref, x_ref, w_ref, out_ref = refs
        b_ref = None

    tm = adj_ref.shape[1]            # rows in this node tile (static)

    adj = adj_ref[0]                 # (TM, N_pad)   -- streamed per grid step
    x = x_ref[0]                     # (N_pad, Din)  -- resident per batch element

    # y = adj @ x on the MXU, f32 accumulation.
    y = jnp.dot(adj, x, preferred_element_type=jnp.float32)          # (TM, Din)

    if add_self:
        i = pl.program_id(1)
        start = pl.multiple_of(i * tm, tm)
        y = y + x_ref[0, pl.ds(start, tm), :].astype(jnp.float32)

    # y = y @ W  (weight may be bf16 if compute_dtype was requested).
    w = w_ref[...]
    y = jnp.dot(y.astype(w.dtype), w, preferred_element_type=jnp.float32)  # (TM, Dout_pad)

    if use_bias:
        y = y + b_ref[...].astype(jnp.float32)

    if normalize:
        # F.normalize(p=2, dim=2): y / max(||y||_2, 1e-12). Padded cols are zero,
        # so the norm over the padded width is exact. rsqrt -> EUP (free slot).
        sumsq = jnp.sum(y * y, axis=-1, keepdims=True)
        y = y * lax.rsqrt(jnp.maximum(sumsq, 1e-24))

    out_ref[0] = y.astype(out_ref.dtype)


def graph_conv(x, adj, weight, bias=None, *, add_self=False,
               normalize_embedding=False, dropout=0.0,
               compute_dtype=None, row_tile=256):
    """Pallas GraphConv forward (matches the PyTorch module's eval-mode forward)."""
    # TODO(synk): training-mode dropout (nn.Dropout on x) is not applied.
    B, N, Din = x.shape
    assert adj.shape == (B, N, N)
    assert weight.shape[0] == Din
    Dout = weight.shape[1]
    out_dtype = x.dtype
    use_bias = bias is not None

    if compute_dtype is not None:
        # Cast MXU inputs in the wrapper (halves adj HBM traffic); acc stays f32.
        x = x.astype(compute_dtype)
        adj = adj.astype(compute_dtype)
        weight = weight.astype(compute_dtype)

    itemsize = jnp.dtype(x.dtype).itemsize
    dout_pad = _round_up(Dout, _LANE)

    # Pick the node row-tile: largest multiple of 8 (<= row_tile) whose live
    # buffers fit the VMEM budget. adj is the only streamed (double-buffered) tensor.
    tm = min(_round_up(N, _SUB), _round_up(row_tile, _SUB))
    while True:
        n_pad = _round_up(N, tm)
        est = (2 * tm * n_pad * itemsize           # adj row tile (double-buffered)
               + 2 * n_pad * Din * itemsize        # x (resident)
               + 2 * Din * dout_pad * itemsize     # weight (resident)
               + 2 * dout_pad * 4                  # bias
               + 2 * tm * dout_pad * 4)            # output tile (double-buffered)
        if est <= _VMEM_BUDGET or tm <= _SUB:
            break
        tm = max(_SUB, _round_up(tm // 2, _SUB))
    # TODO(synk): for graphs so large that even TM=8 with resident x exceeds the
    # budget, add a K-tile axis over the adj reduction dim + scratch accumulator.

    # Pad: nodes up to a multiple of TM (zero adj rows/cols are inert), output
    # features up to a multiple of 128 (zero weight/bias columns keep results exact).
    if n_pad != N:
        x = jnp.pad(x, ((0, 0), (0, n_pad - N), (0, 0)))
        adj = jnp.pad(adj, ((0, 0), (0, n_pad - N), (0, n_pad - N)))
    if dout_pad != Dout:
        weight = jnp.pad(weight, ((0, 0), (0, dout_pad - Dout)))
    bias2d = None
    if use_bias:
        bias2d = bias.reshape(1, Dout).astype(jnp.float32)
        if dout_pad != Dout:
            bias2d = jnp.pad(bias2d, ((0, 0), (0, dout_pad - Dout)))

    grid = (B, n_pad // tm)
    in_specs = [
        pl.BlockSpec((1, tm, n_pad), lambda b, i: (b, i, 0)),     # adj row tile (streamed)
        pl.BlockSpec((1, n_pad, Din), lambda b, i: (b, 0, 0)),    # x (resident per b)
        pl.BlockSpec((Din, dout_pad), lambda b, i: (0, 0)),       # weight (resident)
    ]
    inputs = [adj, x, weight]
    if use_bias:
        in_specs.append(pl.BlockSpec((1, dout_pad), lambda b, i: (0, 0)))
        inputs.append(bias2d)

    kernel = functools.partial(
        _graphconv_kernel,
        add_self=add_self,
        normalize=normalize_embedding,
        use_bias=use_bias,
    )

    vmem_limit = int(min(48 * 1024 * 1024,
                         max(32 * 1024 * 1024, est + 8 * 1024 * 1024)))

    out_padded = pl.pallas_call(
        kernel,
        out_shape=jax.ShapeDtypeStruct((B, n_pad, dout_pad), out_dtype),
        grid_spec=pltpu.PrefetchScalarGridSpec(
            num_scalar_prefetch=0,
            grid=grid,
            in_specs=in_specs,
            out_specs=pl.BlockSpec((1, tm, dout_pad), lambda b, i: (b, i, 0)),
        ),
        compiler_params=pltpu.CompilerParams(
            dimension_semantics=("parallel", "parallel"),
            vmem_limit_bytes=vmem_limit,
        ),
    )(*inputs)

    return out_padded[:, :N, :Dout]


def reference_graph_conv(x, adj, weight, bias, *, add_self=False,
                         normalize_embedding=False):
    y = jnp.matmul(adj, x)
    if add_self:
        y = y + x
    y = jnp.matmul(y, weight)
    if bias is not None:
        y = y + bias
    if normalize_embedding:
        n = jnp.maximum(jnp.linalg.norm(y, axis=2, keepdims=True), 1e-12)
        y = y / n
    return y


if __name__ == "__main__":
    key = jax.random.PRNGKey(0)

    # Config 1: bias, no add_self, no normalize (shapes from the module's usage).
    B, N, Din, Dout = 2, 16, 32, 32
    k_x, k_adj, k_w, k_b = jax.random.split(key, 4)
    x = jax.random.normal(k_x, (B, N, Din), dtype=jnp.float32)
    adj = jax.random.uniform(k_adj, (B, N, N), dtype=jnp.float32)
    weight = jax.random.normal(k_w, (Din, Dout), dtype=jnp.float32) * 0.1
    bias = jax.random.normal(k_b, (Dout,), dtype=jnp.float32) * 0.1

    out = jax.block_until_ready(graph_conv(x, adj, weight, bias))
    ref = reference_graph_conv(x, adj, weight, bias)
    assert out.shape == (B, N, Dout)
    assert jnp.allclose(out, ref, atol=1e-4, rtol=1e-4)

    # Config 2: add_self + normalize, no bias, non-aligned shapes exercise padding.
    B2, N2, Din2, Dout2 = 2, 20, 24, 48
    k_x2, k_adj2, k_w2 = jax.random.split(jax.random.PRNGKey(1), 3)
    x2 = jax.random.normal(k_x2, (B2, N2, Din2), dtype=jnp.float32)
    adj2 = jax.random.uniform(k_adj2, (B2, N2, N2), dtype=jnp.float32)
    w2 = jax.random.normal(k_w2, (Din2, Dout2), dtype=jnp.float32) * 0.1
    out2 = jax.block_until_ready(
        graph_conv(x2, adj2, w2, None, add_self=True, normalize_embedding=True))
    ref2 = reference_graph_conv(x2, adj2, w2, None,
                                add_self=True, normalize_embedding=True)
    assert out2.shape == (B2, N2, Dout2)
    assert jnp.allclose(out2, ref2, atol=1e-4, rtol=1e-4)

    # Config 3: force a small row tile (row_tile=8) so the grid has multiple
    # node-row tiles per batch element -> exercises the adj streaming path and
    # the add_self dynamic-slice indexing across tiles.
    out3 = jax.block_until_ready(
        graph_conv(x2, adj2, w2, None, add_self=True, normalize_embedding=True,
                   row_tile=8))
    assert out3.shape == (B2, N2, Dout2)
    assert jnp.allclose(out3, ref2, atol=1e-4, rtol=1e-4)

    print("KERNEL_OK")
</pallas_src>

<mosaic_0001>
module attributes {stable_mosaic.version = 11 : i64} {
  func.func @_graphconv_kernel(%arg0: i32, %arg1: i32, %arg2: memref<1x16x16xf32, #tpu.memory_space<vmem>>, %arg3: memref<1x16x32xf32, #tpu.memory_space<vmem>>, %arg4: memref<32x128xf32, #tpu.memory_space<vmem>>, %arg5: memref<1x128xf32, #tpu.memory_space<vmem>>, %arg6: memref<1x16x128xf32, #tpu.memory_space<vmem>>) attributes {dimension_semantics = [#tpu.dimension_semantics<parallel>, #tpu.dimension_semantics<parallel>], iteration_bounds = array<i64: 2, 1>, scalar_prefetch = 0 : i64, scratch_operands = 0 : i64, tpu.core_type = #tpu.core_type<tc>, window_params = [{transform_indices = @transform_0, window_bounds = array<i64: 1, 16, 16>}, {transform_indices = @transform_1, window_bounds = array<i64: 1, 16, 32>}, {pipeline_mode = #tpu.pipeline_mode<synchronous>, transform_indices = @transform_2, window_bounds = array<i64: 32, 128>}, {pipeline_mode = #tpu.pipeline_mode<synchronous>, transform_indices = @transform_3, window_bounds = array<i64: 1, 128>}, {transform_indices = @transform_4, window_bounds = array<i64: 1, 16, 128>}]} {
    %c0 = arith.constant 0 : index
    %c0_0 = arith.constant 0 : index
    %c0_1 = arith.constant 0 : index
    %0 = vector.load %arg2[%c0, %c0_0, %c0_1] : memref<1x16x16xf32, #tpu.memory_space<vmem>>, vector<1x16x16xf32>
    %1 = vector.shape_cast %0 : vector<1x16x16xf32> to vector<16x16xf32>
    %c0_2 = arith.constant 0 : index
    %c0_3 = arith.constant 0 : index
    %c0_4 = arith.constant 0 : index
    %2 = vector.load %arg3[%c0_2, %c0_3, %c0_4] : memref<1x16x32xf32, #tpu.memory_space<vmem>>, vector<1x16x32xf32>
    %3 = vector.shape_cast %2 : vector<1x16x32xf32> to vector<16x32xf32>
    %cst = arith.constant dense<0.000000e+00> : vector<16x32xf32>
    %4 = tpu.matmul %1, %3, %cst {dimension_numbers = #tpu.dot_dimension_numbers<[1], [0], [0], [1], [0, 0, 1, 1], [], []>} : vector<16x16xf32>, vector<16x32xf32>, vector<16x32xf32> -> vector<16x32xf32>
    %c0_5 = arith.constant 0 : index
    %c0_6 = arith.constant 0 : index
    %5 = vector.load %arg4[%c0_5, %c0_6] : memref<32x128xf32, #tpu.memory_space<vmem>>, vector<32x128xf32>
    %cst_7 = arith.constant dense<0.000000e+00> : vector<16x128xf32>
    %6 = tpu.matmul %4, %5, %cst_7 {dimension_numbers = #tpu.dot_dimension_numbers<[1], [0], [0], [1], [0, 0, 1, 1], [], []>} : vector<16x32xf32>, vector<32x128xf32>, vector<16x128xf32> -> vector<16x128xf32>
    %c0_8 = arith.constant 0 : index
    %c0_9 = arith.constant 0 : index
    %7 = vector.load %arg5[%c0_8, %c0_9] : memref<1x128xf32, #tpu.memory_space<vmem>>, vector<1x128xf32>
    %8 = vector.broadcast %7 : vector<1x128xf32> to vector<16x128xf32>
    %9 = arith.addf %6, %8 : vector<16x128xf32>
    %c0_10 = arith.constant 0 : index
    %c0_11 = arith.constant 0 : index
    %c0_12 = arith.constant 0 : index
    %10 = vector.load %arg6[%c0_10, %c0_11, %c0_12] : memref<1x16x128xf32, #tpu.memory_space<vmem>>, vector<1x16x128xf32>
    %11 = vector.shape_cast %10 : vector<1x16x128xf32> to vector<16x128xf32>
    %12 = vector.shape_cast %9 : vector<16x128xf32> to vector<1x16x128xf32>
    tpu.vector_store %arg6[%c0_10, %c0_11, %c0_12], %12 {strides = array<i32>} : memref<1x16x128xf32, #tpu.memory_space<vmem>>, vector<1x16x128xf32>,
    return
  }
  func.func @transform_0(%arg0: i32, %arg1: i32) -> (i32, i32, i32) {
    %c0_i32 = arith.constant 0 : i32
    %c0_i32_0 = arith.constant 0 : i32
    return %arg0, %arg1, %c0_i32 : i32, i32, i32
  }
  func.func @transform_1(%arg0: i32, %arg1: i32) -> (i32, i32, i32) {
    %c0_i32 = arith.constant 0 : i32
    %c0_i32_0 = arith.constant 0 : i32
    %c0_i32_1 = arith.constant 0 : i32
    return %arg0, %c0_i32, %c0_i32_0 : i32, i32, i32
  }
  func.func @transform_2(%arg0: i32, %arg1: i32) -> (i32, i32) {
    %c0_i32 = arith.constant 0 : i32
    %c0_i32_0 = arith.constant 0 : i32
    %c0_i32_1 = arith.constant 0 : i32
    return %c0_i32, %c0_i32_0 : i32, i32
  }
  func.func @transform_3(%arg0: i32, %arg1: i32) -> (i32, i32) {
    %c0_i32 = arith.constant 0 : i32
    %c0_i32_0 = arith.constant 0 : i32
    %c0_i32_1 = arith.constant 0 : i32
    return %c0_i32, %c0_i32_0 : i32, i32
  }
  func.func @transform_4(%arg0: i32, %arg1: i32) -> (i32, i32, i32) {
    %c0_i32 = arith.constant 0 : i32
    %c0_i32_0 = arith.constant 0 : i32
    return %arg0, %arg1, %c0_i32 : i32, i32, i32
  }
}

</mosaic_0001>

<bundles_post_ra>
// kernel: tpu_custom_call.1
= control target key start
LH: loop header
LB: loop body
LE: loop exit
PB: predicated region body
PF: predicated region fallthrough
CT: control target
= control target key end

     0   :  { %s1164_s0 = inlined_call_operand.hbm [shape: f32[2,16,16], index: 0, kind: input, shape index: {}]   ;;  %s1165_s1 = inlined_call_operand.hbm [shape: f32[2,16,32], index: 1, kind: input, shape index: {}]   ;;  %s1166_s2 = inlined_call_operand.hbm [shape: f32[32,128], index: 2, kind: input, shape index: {}]   ;;  %s1167_s3 = inlined_call_operand.vmem [shape: f32[1,128], index: 3, kind: input, shape index: {}]   ;;  %s1168_s4 = inlined_call_operand.hbm [shape: f32[2,16,128], index: 4, kind: output, shape index: {}]  }
   0x1   :  { %1175 = sst [smem:[#allocation15_spill]] %s1166_s2 }
   0x2   :  { %9 = vsyncpa [#allocation3], 0 }
   0x3   :  { %11 = vsyncpa [#allocation3 + $0x1], 0 }
   0x4   :  { %12 = vsyncpa [#allocation6], 0 }
   0x5   :  { %14 = vsyncpa [#allocation6 + $0x1], 0 }
   0x6   :  { %15 = vsyncpa [#allocation4], 0 }
   0x7   :  { %17 = vsyncpa [#allocation4 + $0x1], 0  ;;  %s950_s15 = smov 0   ;;  %s952_s16 = smov 0  }
   0x8   :  { %s954_s17 = smov 0   ;;  %s956_s18 = smov 0  }
   0x9   :  { %s958_s19 = smov 0   ;;  %s960_s20 = smov 0  }
   0xa LB: > { %1176 = sst [smem:[#allocation13_spill]] %s911_s19  ;;  %s981_s21 = sadd.s32 4294967295, %s915_s20   ;;  %s915_s20 = sphi %s960_s20, %s23_s20   ;;  %s911_s19 = sphi %s958_s19, %s1192_s19   ;;  %s907_s18 = sphi %s956_s18, %s1191_s18   ;;  %s903_s17 = sphi %s954_s17, %s1195_s17   ;;  %s899_s16 = sphi %s952_s16, %s1194_s16   ;;  %s895_s15 = sphi %s950_s15, %s1193_s15  }
   0xb   : > { %s607_s22 = sadd.s32 4294967294, %s915_s20   ;;  %p57_p0 = scmp.ne.s32.totalorder %s899_s16, %s895_s15 }
   0xc   : > { %p58_p1 = scmp.eq.s32.totalorder %s981_s21, 0  ;;  %p157_p3 = scmp.eq.s32.totalorder %s607_s22, 1 }
   0xd   : > { %p608_p5 = scmp.ge.s32.totalorder %s915_s20, 1  ;;  %p164_p7 = scmp.lt.s32.totalorder %s915_s20, 3 }
   0xe   : > { %p990_p4 = por %p58_p1, %p57_p0  ;;  %p995_p6 = por %p157_p3, %p57_p0 }
   0xf   : > { %p1000_p8 = pnand %p608_p5, %p164_p7  ;;  %s917_s26 = smov [#allocation7]  }
  0x10   : > { %s1178_s24 = scalar_select %p995_p6, 1, 0 }
  0x11   : > { %s176_s27 = sshll.u32 %s917_s26, 4  ;;  %p673_p9 = pneg %p1000_p8  ;;  %s177_s27 = int_to_ptr.vmem [resolvable:$true] %s176_s27 }
  0x12   : > { %s35_s29 = sadd.s32 1, %s911_s19  ;;  %s756_s30 = scalar_lea.vmem %s177_s27, 512 }
  0x13   : > { %p1009_p11 = pnand %p673_p9, %p58_p1  ;;  %p757_p13 = scmp.ne.s32.totalorder %s177_s27, %s756_s30 }
  0x14   : > { %p764_p5 = scmp.lt.s32.totalorder %s177_s27, %s177_s27  ;;  %p765_p7 = scmp.lt.s32.totalorder %s756_s30, %s756_s30 }
  0x15   : > { %p747_p12 = pneg %p1009_p11 }
  0x16   : > { %p766_p2 = por %p765_p7, %p764_p5 }
  0x17   : > { %p759_p0 = pnand %p757_p13, %p747_p12 }
  0x19   : > { %p760_p3 = pneg %p759_p0 }
  0x1b   : > { %p767_p6 = pnand %p766_p2, %p760_p3 }
  0x1d   : > { %770 = shalt.err (!%p767_p6)
}
  0x1e   : > { %s1169_s5 = smov 128   ;;  %s1171_s6 = smov 8  }
  0x1f   : > { %s1181_s2 = sld [smem:[#allocation15_spill]]  ;;  %p37_p2 = scmp.ge.s32.totalorder %s35_s29, 2 }
  0x20   : > { %s44_s9 = sadd.s32 1, %s903_s17  ;;  %p51_p6 = scmp.ne.s32.totalorder %s903_s17, %s899_s16 }
  0x21   : > { %p52_p9 = scmp.eq.s32.totalorder %s915_s20, 0  ;;  %s1197_s29 = smov (%p37_p2, %s35_s29), 0 }
  0x22   : > { %1182 = sst [smem:[#allocation14_spill]] %s1197_s29  ;;  %p1184_p13 = scmp.eq.s32.totalorder %s981_s21, 1 }
  0x23   : > { %p1030_p12 = por %p52_p9, %p51_p6  ;;  %s39_s12 = ssub.s32 %s911_s19, %s1197_s29 }
  0x24   : > { %p1036_p0 = por %p1184_p13, %p51_p6  ;;  %p689_p3 = scmp.lt.s32.totalorder %s915_s20, 2 }
  0x25   : > { %676 = dma.hbm_to_vmem [thread:$0]  (!%p1009_p11), %s1181_s2, 512, %s177_s27, [#allocation6], %s1169_s5, %s1169_s5, %s1171_s6  }
  0x26   : > { %p42_p11 = scmp.eq.s32.totalorder %s39_s12, 0  ;;  %s193_s13 = sand.u32 1, %s903_s17  }
  0x27   : > { %s611_s14 = sshll.u32 %s193_s13, 4  ;;  %s632_s26 = sshll.u32 %s911_s19, 8 }
  0x28   : > { %s1045_s22 = scalar_select %p42_p11, %s903_s17, %s44_s9  }
  0x29   : > { %s205_s30 = scalar_lea.hbm %s1164_s0, %s632_s26  ;;  %s197_s7 = scalar_lea.vmem [#allocation2], %s611_s14 }
  0x2a   : > { %s206_s8 = sshll.u32 %s197_s7, 4  ;;  %p1053_p5 = pnand %p689_p3, %p1030_p12  ;;  %s207_s8 = int_to_ptr.vmem [resolvable:$true] %s206_s8 }
  0x2b   : > { %s1060_s9 = scalar_lea.hbm %s1165_s1, %s632_s26  ;;  %s220_s12 = scalar_lea.vmem [#allocation5], %s611_s14 }
  0x2c   : > { %s227_s29 = sshll.u32 %s220_s12, 4  ;;  %s194_s19 = scalar_lea.sflag [#allocation3], %s193_s13  ;;  %s228_s29 = int_to_ptr.vmem [resolvable:$true] %s227_s29 }
  0x2d   : > { %p773_p7 = pneg %p1053_p5  ;;  %s784_s27 = scalar_lea.vmem %s207_s8, 256 }
  0x2e   : > { %p785_p2 = scmp.ne.s32.totalorder %s207_s8, %s784_s27  ;;  %s920_s10 = smov [#allocation2]  }
  0x2f   : > { %s789_s28 = sshll.u32 %s920_s10, 4  ;;  %s790_s28 = int_to_ptr.vmem [resolvable:$false] %s789_s28 }
  0x30   : > { %p787_p6 = pnand %p785_p2, %p773_p7  ;;  %s791_s7 = scalar_lea.vmem %s790_s28, 512 }
  0x31   : > { %p792_p12 = scmp.lt.s32.totalorder %s207_s8, %s790_s28  ;;  %p793_p13 = scmp.lt.s32.totalorder %s791_s7, %s784_s27 }
  0x32   : > { %p788_p9 = pneg %p787_p6 }
  0x33   : > { %p794_p3 = por %p793_p13, %p792_p12 }
  0x35   : > { %p795_p11 = pnand %p794_p3, %p788_p9 }
  0x37   : > { %798 = shalt.err (!%p795_p11)
}
  0x38   : > { %s1187_s2 = smov 8   ;;  %s1188_s6 = smov 128  }
  0x39   : > { %680 = dma.hbm_to_vmem [thread:$0]  (!%p1053_p5), %s205_s30, 256, %s207_s8, %s194_s19, %s1188_s6, %s1188_s6, %s1187_s2  }
  0x3a   : > { %s216_s13 = sand.u32 1, %s915_s20   ;;  %s812_s26 = scalar_lea.vmem %s228_s29, 256 }
  0x3b   : > { %s217_s14 = scalar_lea.sflag [#allocation6], %s216_s13  ;;  %p813_p2 = scmp.ne.s32.totalorder %s228_s29, %s812_s26 }
  0x3c   : > { %s921_s12 = smov [#allocation5]  }
  0x3d   : > { %p815_p6 = pnand %p813_p2, %p773_p7  ;;  %s817_s27 = sshll.u32 %s921_s12, 4  ;;  %s818_s27 = int_to_ptr.vmem [resolvable:$false] %s817_s27 }
  0x3e   : > { %s819_s10 = scalar_lea.vmem %s818_s27, 512  ;;  %p820_p9 = scmp.lt.s32.totalorder %s228_s29, %s818_s27 }
  0x3f   : > { %p816_p10 = pneg %p815_p6  ;;  %p821_p12 = scmp.lt.s32.totalorder %s819_s10, %s812_s26 }
  0x41   : > { %p822_p13 = por %p821_p12, %p820_p9 }
  0x43   : > { %p823_p3 = pnand %p822_p13, %p816_p10 }
  0x45   : > { %826 = shalt.err (!%p823_p3)
}
  0x46   : > { %683 = dma.hbm_to_vmem [thread:$0]  (!%p1053_p5), %s1060_s9, 256, %s228_s29, %s217_s14, %s1188_s6, %s1188_s6, %s1187_s2  }
  0x47   : > { %239 = sbr.rel (%p1000_p8) target bundleno = 494 (0x1ee), region = 36  ;;  %s1085_s19 = sand.u32 (!%p1000_p8), 1, %s899_s16  }
  0x48   : > { %s1088_s30 = sshll.u32 (!%p1000_p8), %s1085_s19, 4  ;;  %s242_s8 = scalar_lea.sflag (!%p1000_p8), [#allocation3], %s1085_s19 }
  0x49   : > { %s245_s28 = scalar_lea.vmem (!%p1000_p8), [#allocation2], %s1088_s30 }
  0x4c   : > { %878 = dma.done.wait (%p990_p4), %s242_s8, 256  }
  0x4d   : > { %880 = vsyncadd (%p990_p4), %s242_s8, 4294967040  ;;  %s250_s25 = sand.u32 1, %s981_s21   ;;  %s254_s5 = scalar_lea.vmem [#allocation5], %s1088_s30 }
  0x4e   : > { %s251_s29 = scalar_lea.sflag [#allocation6], %s250_s25 }
  0x4f   : > { %882 = dma.done.wait (%p990_p4), %s251_s29, 256  }
  0x50   : > { %884 = vsyncadd (%p990_p4), %s251_s29, 4294967040 }
  0x51   : > { %886 = dma.done.wait (%p58_p1), [#allocation6], 512  }
  0x52   : > { %888 = vsyncadd (%p58_p1), [#allocation6], 4294966784  ;;  %vm294_vm0 = vcmask 130048   ;;  %v293_v0 = vld [vmem:[%s254_s5 + $0x8] sm:$0xff]  ;;  %v292_v1 = vld [vmem:[%s254_s5] sm:$0xff]  ;;  %vm387_vm1 = vcmask 261120  }
  0x53   : > { %v290_v2 = vld [vmem:[%s245_s28] sm:$0xff]  ;;  %645 = vmatprep.subr.mxu0 %v293_v0  ;;  %v379_v3 = vld [vmem:[#allocation7 + $0x18] sm:$0xff]  ;;  %v377_v6 = vld [vmem:[#allocation7 + $0x8] sm:$0xff]  ;;  %s287_s9 = scalar_lea.vmem [#allocation8], %s1088_s30  ;;  %s634_s2 = sshll.u32 %s907_s18, 8 }
  0x54   : > { %649 = vmatprep.mubr.msk.f32.mxu0 %vm294_vm0, %v290_v2  ;;  %v378_v4 = vld [vmem:[#allocation7 + $0x10] sm:$0xff]  ;;  %646 = vmatpush3.msra.mxu0 %v293_v0  ;;  %v291_v5 = vld [vmem:[%s245_s28 + $0x8] sm:$0xff]  ;;  %v376_v7 = vld [vmem:[#allocation7] sm:$0xff]  ;;  %s487_s7 = sshll.u32 %s287_s9, 4  ;;  %s1116_s14 = scalar_lea.hbm %s1168_s4, %s634_s2  ;;  %s1111_s7 = int_to_ptr.vmem [resolvable:$true] %s487_s7 }
  0x55   : > { %652 = vmatprep.subr.mxu1 %v379_v3  ;;  %647 = vmatprep.subr.mxu0 %v292_v1  ;;  %v624_v10 = vld [vmem:[%s1167_s3] ss:$0 sm:$0xff]  ;;  %s472_s26 = scalar_lea.sflag [#allocation4], %s1085_s19  ;;  %s827_s12 = scalar_lea.vmem %s1111_s7, 256 }
  0x56   : > { %653 = vmatpush3.msra.mxu1 %v379_v3  ;;  %648 = vmatpush3.msra.mxu0 %v292_v1  ;;  %p828_p1 = scmp.ne.s32.totalorder %s1111_s7, %s827_s12  ;;  %s922_s18 = smov [#allocation8]  }
  0x57   : > { %654 = vmatprep.subr.mxu1 %v378_v4  ;;  %650 = vmatmul.mubr.msk.f32.vlgmr.msra.gmra.mxu0 %vm294_vm0, %v291_v5  ;;  %s831_s27 = sshll.u32 %s922_s18, 4  ;;  %s832_s27 = int_to_ptr.vmem [resolvable:$false] %s831_s27 }
  0x58   : > { %655 = vmatpush3.msra.mxu1 %v378_v4  ;;  %p829_p4 = pnand %p828_p1, %p1036_p0  ;;  %s833_s10 = scalar_lea.vmem %s832_s27, 512 }
  0x59   : > { %656 = vmatprep.subr.mxu1 %v377_v6  ;;  %p834_p10 = scmp.lt.s32.totalorder %s1111_s7, %s832_s27  ;;  %p835_p5 = scmp.lt.s32.totalorder %s833_s10, %s827_s12 }
  0x5a   : > { %657 = vmatpush3.msra.mxu1 %v377_v6  ;;  %p830_p8 = pneg %p829_p4 }
  0x5b   : > { %658 = vmatprep.subr.mxu1 %v376_v7  ;;  %p836_p7 = por %p835_p5, %p834_p10 }
  0x5c   : > { %659 = vmatpush3.msra.mxu1 %v376_v7 }
  0x5d   : > { %p837_p11 = pnand %p836_p7, %p830_p8 }
 0x117   : > { %v651_v8 = vpop.f32.mrf.mxu0 }
 0x119   : > { %v367_v9 = vpop.f32.mrf.mxu0 }
 0x11a   : > { %660 = vmatprep.mubr.msk.f32.mxu1 %vm387_vm1, %v367_v9 }
 0x11b   : > { %661 = vmatmul.mubr.msk.f32.vlgmr.msra.gmra.mxu1 %vm387_vm1, %v651_v8 }
 0x1db   : > { %v662_v11 = vpop.f32.mrf.mxu1 }
 0x1dc   : > { %v466_v12 = vadd.f32 %v662_v11, %v624_v10 }
 0x1dd   : > { %v460_v13 = vpop.f32.mrf.mxu1 }
 0x1de   : > { %470 = vst [vmem:[%s287_s9 + $0x8] sm:$0xff] %v466_v12  ;;  %v461_v14 = vadd.f32 %v624_v10, %v460_v13 }
 0x1e0   : > { %469 = vst [vmem:[%s287_s9] sm:$0xff] %v461_v14 }
 0x1e1   : > { %840 = shalt.err (!%p837_p11)
}
 0x1e2   : > { %s841_s30 = scalar_lea.hbm %s1116_s14, 256  ;;  %s845_s25 = scalar_lea.hbm %s1168_s4, 512 }
 0x1e3   : > { %p842_p2 = scmp.ne.s32.totalorder %s1116_s14, %s841_s30  ;;  %p846_p12 = scmp.lt.s32.totalorder %s1116_s14, %s1168_s4 }
 0x1e4   : > { %p847_p13 = scmp.lt.s32.totalorder %s845_s25, %s841_s30 }
 0x1e5   : > { %p843_p6 = pnand %p842_p2, %p1036_p0 }
 0x1e6   : > { %p848_p3 = por %p847_p13, %p846_p12 }
 0x1e7   : > { %p844_p9 = pneg %p843_p6 }
 0x1e9   : > { %p849_p1 = pnand %p848_p3, %p844_p9 }
 0x1eb   : > { %852 = shalt.err (!%p849_p1)
}
 0x1ec   : > { %s923_s21 = smov 128   ;;  %s924_s23 = smov 8  }
 0x1ed   : > { %671 = dma.vmem_to_hbm [thread:$0]  (%p1036_p0), %s1111_s7, 256, %s1116_s14, %s472_s26, %s923_s21, %s923_s21, %s924_s23  }
 0x1ee PF: > { %s502_s9 = sand.u32 1, %s895_s15   ;;  %p1189_p4 = scmp.ne.s32.totalorder %s1178_s24, 0 }
 0x1ef   : > { %p1190_p8 = scmp.ge.s32.totalorder %s915_s20, 2  ;;  %s503_s2 = scalar_lea.sflag [#allocation4], %s502_s9 }
 0x1f1   : > { %p685_p10 = pnand %p1190_p8, %p1189_p4 }
 0x1f3   : > { %p686_p5 = pneg %p685_p10 }
 0x1f5   : > { %890 = dma.done.wait (%p686_p5), %s503_s2, 256  }
 0x1f6   : > { %892 = vsyncadd (%p686_p5), %s503_s2, 4294967040  ;;  %s23_s20 = sadd.s32 1, %s915_s20   ;;  %s1191_s18 = sld [smem:[#allocation13_spill]] }
 0x1f7   : > { %p20_p7 = scmp.ge.s32.totalorder %s23_s20, 4   ;;  %s1192_s19 = sld [smem:[#allocation14_spill]] }
 0x1f8   : > { %s1193_s15 = smov %s899_s16  ;;  %s1194_s16 = smov %s903_s17 }
 0x1f9   : > { %s1195_s17 = smov %s1045_s22  ;;  %22 = sbr.rel (!%p20_p7) target bundleno = 10 (0xa), region = 98 }
 0x1fe   :  { %508 = vsyncpa [#allocation3], 1 }
 0x1ff   :  { %510 = vsyncpa [#allocation3 + $0x1], 1 }
 0x200   :  { %511 = vsyncpa [#allocation6], 1 }
 0x201   :  { %513 = vsyncpa [#allocation6 + $0x1], 1 }
 0x202   :  { %514 = vsyncpa [#allocation4], 1 }
 0x203   :  { %516 = vsyncpa [#allocation4 + $0x1], 1 }

</bundles_post_ra>
